<compile_context>
chip_gen: v7x
topology: tpu7x:2x2x1
jax: 0.10.0
libtpu: 0.0.40
codegen_flags: <defaults>
</compile_context>

<pallas_src>
import functools

import jax
import jax.numpy as jnp
import numpy as np
from jax.experimental import pallas as pl
from jax.experimental.pallas import tpu as pltpu

_LANES = 128  # TPU lane width; everything is padded to this on the feature axis.


def _ffnn_kernel(num_mm_layers, w_last_off, bias_off, p_ref, x_ref, o_ref):
    """One batch tile of TheNet.forward.

    p_ref : (rows, 128) packed parameter slab (resident in VMEM).
    x_ref : (TB, 128)   zero-padded input tile (true features in lanes [0, input_size)).
    o_ref : (1, TB)     lane-dense output tile (batch laid out on the lane axis).
    """
    u = x_ref[...]                                                     # (TB, 128)

    # layer_first + hidden layers: (TB,128) @ (128,128) + bias, ReLU. Unrolled at trace time.
    for l in range(num_mm_layers):
        w = p_ref[_LANES * l:_LANES * (l + 1), :]                      # (128, 128)
        b = p_ref[bias_off + l:bias_off + l + 1, :]                    # (1, 128)
        u = jnp.dot(u, w, preferred_element_type=jnp.float32) + b
        u = jnp.maximum(u, 0.0)

    # layer_last (out_features = 1): VPU multiply + sublane reduce, lane-dense store.
    u_t = u.T                                                          # (128, TB) XLU transpose
    w_last = p_ref[w_last_off:w_last_off + _LANES, 0:1]                # (128, 1)
    b_last = p_ref[bias_off + num_mm_layers:bias_off + num_mm_layers + 1, 0:1]  # (1, 1)
    o_ref[...] = jnp.sum(u_t * w_last, axis=0, keepdims=True) + b_last


def _pack_params(params, input_size, nn_width, num_hidden):
    """Pack all layers into one (rows, 128) f32 slab.

    rows [0, 128*L)            : L = num_hidden+1 matmul weights, each zero-padded to 128x128
    rows [128*L, 128*L+128)    : last-layer weight as a column at lane 0
    rows [bias_off, ...)       : one bias row per layer (last-layer bias at lane 0)
    """
    num_mm = num_hidden + 1
    w_last_off = _LANES * num_mm
    bias_off = w_last_off + _LANES
    rows = ((bias_off + num_mm + 1 + 7) // 8) * 8
    slab = jnp.zeros((rows, _LANES), jnp.float32)

    w0, b0 = params["first"]                                   # (in, width), (1, width)
    slab = slab.at[0:input_size, 0:nn_width].set(w0)
    slab = slab.at[bias_off, 0:nn_width].set(b0.reshape(nn_width))

    for h, (w, b) in enumerate(params["hidden"]):              # (width, width), (1, width)
        r0 = _LANES * (1 + h)
        slab = slab.at[r0:r0 + nn_width, 0:nn_width].set(w)
        slab = slab.at[bias_off + 1 + h, 0:nn_width].set(b.reshape(nn_width))

    w_last, b_last = params["last"]                            # (width, 1), (1, 1)
    slab = slab.at[w_last_off:w_last_off + nn_width, 0].set(w_last.reshape(nn_width))
    slab = slab.at[bias_off + num_mm, 0].set(b_last.reshape(())) 
    return slab, w_last_off, bias_off


def the_net_forward(x, params, *, tile_batch=256):
    """params = dict with 'first', 'hidden' (list), 'last'; each (W[in,out], b[1,out])."""
    assert tile_batch % _LANES == 0
    batch, input_size = x.shape
    nn_width = params["first"][0].shape[1]
    num_hidden = len(params["hidden"])
    num_mm = num_hidden + 1

    num_tiles = -(-batch // tile_batch)          # cdiv
    b_pad = num_tiles * tile_batch

    # Zero-pad input to (B_pad, 128): batch rows to a full tile, features to the lane width.
    x_pad = jnp.zeros((b_pad, _LANES), jnp.float32)
    x_pad = x_pad.at[:batch, :input_size].set(x.astype(jnp.float32))

    slab, w_last_off, bias_off = _pack_params(params, input_size, nn_width, num_hidden)
    rows = slab.shape[0]

    kernel = functools.partial(_ffnn_kernel, num_mm, w_last_off, bias_off)
    out_row = pl.pallas_call(
        kernel,
        out_shape=jax.ShapeDtypeStruct((1, b_pad), jnp.float32),
        grid=(num_tiles,),
        in_specs=[
            pl.BlockSpec((rows, _LANES), lambda i: (0, 0)),        # params: resident
            pl.BlockSpec((tile_batch, _LANES), lambda i: (i, 0)),  # x: tiled over batch
        ],
        out_specs=pl.BlockSpec((1, tile_batch), lambda i: (0, i)), # lane-dense output
        compiler_params=pltpu.CompilerParams(dimension_semantics=("parallel",)),
    )(slab, x_pad)

    return out_row[0, :batch].reshape(batch, 1)


def init_params(key, nn_width, num_hidden, input_size):
    """Deterministic init mimicking nn.Linear's U(-1/sqrt(fan_in), 1/sqrt(fan_in))."""
    def linear(k, fan_in, fan_out):
        kw, kb = jax.random.split(k)
        bound = 1.0 / jnp.sqrt(jnp.float32(fan_in))
        w = jax.random.uniform(kw, (fan_in, fan_out), jnp.float32, -bound, bound)
        b = jax.random.uniform(kb, (1, fan_out), jnp.float32, -bound, bound)
        return w, b

    keys = jax.random.split(key, num_hidden + 2)
    return {
        "first": linear(keys[0], input_size, nn_width),
        "hidden": [linear(keys[1 + h], nn_width, nn_width) for h in range(num_hidden)],
        "last": linear(keys[-1], nn_width, 1),
    }


def reference_forward_np(x, params):
    """float64 numpy reference of TheNet.forward for verification."""
    u = np.asarray(x, np.float64)
    w, b = params["first"]
    u = np.maximum(u @ np.asarray(w, np.float64) + np.asarray(b, np.float64), 0.0)
    for w, b in params["hidden"]:
        u = np.maximum(u @ np.asarray(w, np.float64) + np.asarray(b, np.float64), 0.0)
    w, b = params["last"]
    return u @ np.asarray(w, np.float64) + np.asarray(b, np.float64)


if __name__ == "__main__":
    nn_width = 32
    num_hidden = 2
    input_size = 4
    batch = 8

    key = jax.random.PRNGKey(0)
    kx, kp = jax.random.split(key)
    x = jax.random.normal(kx, (batch, input_size), jnp.float32)
    params = init_params(kp, nn_width, num_hidden, input_size)

    out = jax.block_until_ready(the_net_forward(x, params))

    ref = reference_forward_np(np.asarray(x), params)
    assert out.shape == (batch, 1)
    # Tolerance covers TPU default matmul precision (bf16 passes) vs the float64 reference.
    assert np.allclose(np.asarray(out, np.float64), ref, atol=2e-2, rtol=2e-2)

    print("KERNEL_OK")
</pallas_src>

<mosaic_0001>
module attributes {stable_mosaic.version = 11 : i64} {
  func.func @_ffnn_kernel(%arg0: i32, %arg1: memref<520x128xf32, #tpu.memory_space<vmem>>, %arg2: memref<256x128xf32, #tpu.memory_space<vmem>>, %arg3: memref<1x256xf32, #tpu.memory_space<vmem>>) attributes {dimension_semantics = [#tpu.dimension_semantics<parallel>], iteration_bounds = array<i64: 1>, scalar_prefetch = 0 : i64, scratch_operands = 0 : i64, tpu.core_type = #tpu.core_type<tc>, window_params = [{pipeline_mode = #tpu.pipeline_mode<synchronous>, transform_indices = @transform_0, window_bounds = array<i64: 520, 128>}, {transform_indices = @transform_1, window_bounds = array<i64: 256, 128>}, {transform_indices = @transform_2, window_bounds = array<i64: 1, 256>}]} {
    %c0 = arith.constant 0 : index
    %c0_0 = arith.constant 0 : index
    %0 = vector.load %arg2[%c0, %c0_0] : memref<256x128xf32, #tpu.memory_space<vmem>>, vector<256x128xf32>
    %c0_1 = arith.constant 0 : index
    %c0_2 = arith.constant 0 : index
    %1 = vector.load %arg1[%c0_1, %c0_2] : memref<520x128xf32, #tpu.memory_space<vmem>>, vector<128x128xf32>
    %c512 = arith.constant 512 : index
    %c0_3 = arith.constant 0 : index
    %2 = vector.load %arg1[%c512, %c0_3] : memref<520x128xf32, #tpu.memory_space<vmem>>, vector<1x128xf32>
    %cst = arith.constant dense<0.000000e+00> : vector<256x128xf32>
    %3 = tpu.matmul %0, %1, %cst {dimension_numbers = #tpu.dot_dimension_numbers<[1], [0], [0], [1], [0, 0, 1, 1], [], []>} : vector<256x128xf32>, vector<128x128xf32>, vector<256x128xf32> -> vector<256x128xf32>
    %4 = vector.broadcast %2 : vector<1x128xf32> to vector<256x128xf32>
    %5 = arith.addf %3, %4 : vector<256x128xf32>
    %cst_4 = arith.constant 0.000000e+00 : f32
    %6 = vector.broadcast %cst_4 : f32 to vector<256x128xf32>
    %7 = arith.maximumf %5, %6 : vector<256x128xf32>
    %c128 = arith.constant 128 : index
    %c0_5 = arith.constant 0 : index
    %8 = vector.load %arg1[%c128, %c0_5] : memref<520x128xf32, #tpu.memory_space<vmem>>, vector<128x128xf32>
    %c513 = arith.constant 513 : index
    %c0_6 = arith.constant 0 : index
    %9 = vector.load %arg1[%c513, %c0_6] : memref<520x128xf32, #tpu.memory_space<vmem>>, vector<1x128xf32>
    %cst_7 = arith.constant dense<0.000000e+00> : vector<256x128xf32>
    %10 = tpu.matmul %7, %8, %cst_7 {dimension_numbers = #tpu.dot_dimension_numbers<[1], [0], [0], [1], [0, 0, 1, 1], [], []>} : vector<256x128xf32>, vector<128x128xf32>, vector<256x128xf32> -> vector<256x128xf32>
    %11 = vector.broadcast %9 : vector<1x128xf32> to vector<256x128xf32>
    %12 = arith.addf %10, %11 : vector<256x128xf32>
    %cst_8 = arith.constant 0.000000e+00 : f32
    %13 = vector.broadcast %cst_8 : f32 to vector<256x128xf32>
    %14 = arith.maximumf %12, %13 : vector<256x128xf32>
    %c256 = arith.constant 256 : index
    %c0_9 = arith.constant 0 : index
    %15 = vector.load %arg1[%c256, %c0_9] : memref<520x128xf32, #tpu.memory_space<vmem>>, vector<128x128xf32>
    %c514 = arith.constant 514 : index
    %c0_10 = arith.constant 0 : index
    %16 = vector.load %arg1[%c514, %c0_10] : memref<520x128xf32, #tpu.memory_space<vmem>>, vector<1x128xf32>
    %cst_11 = arith.constant dense<0.000000e+00> : vector<256x128xf32>
    %17 = tpu.matmul %14, %15, %cst_11 {dimension_numbers = #tpu.dot_dimension_numbers<[1], [0], [0], [1], [0, 0, 1, 1], [], []>} : vector<256x128xf32>, vector<128x128xf32>, vector<256x128xf32> -> vector<256x128xf32>
    %18 = vector.broadcast %16 : vector<1x128xf32> to vector<256x128xf32>
    %19 = arith.addf %17, %18 : vector<256x128xf32>
    %cst_12 = arith.constant 0.000000e+00 : f32
    %20 = vector.broadcast %cst_12 : f32 to vector<256x128xf32>
    %21 = arith.maximumf %19, %20 : vector<256x128xf32>
    %22 = tpu.transpose %21, [1, 0] : vector<256x128xf32> -> vector<128x256xf32>
    %c384 = arith.constant 384 : index
    %c0_13 = arith.constant 0 : index
    %23 = vector.load %arg1[%c384, %c0_13] : memref<520x128xf32, #tpu.memory_space<vmem>>, vector<128x1xf32>
    %c515 = arith.constant 515 : index
    %c0_14 = arith.constant 0 : index
    %24 = vector.load %arg1[%c515, %c0_14] : memref<520x128xf32, #tpu.memory_space<vmem>>, vector<1x1xf32>
    %25 = vector.broadcast %23 : vector<128x1xf32> to vector<128x256xf32>
    %26 = arith.mulf %22, %25 : vector<128x256xf32>
    %cst_15 = arith.constant dense<0.000000e+00> : vector<256xf32>
    %27 = vector.multi_reduction <add>, %26, %cst_15 [0] : vector<128x256xf32> to vector<256xf32>
    %28 = vector.shape_cast %27 : vector<256xf32> to vector<1x256xf32>
    %29 = vector.broadcast %24 : vector<1x1xf32> to vector<1x256xf32>
    %30 = arith.addf %28, %29 : vector<1x256xf32>
    %c0_16 = arith.constant 0 : index
    %c0_17 = arith.constant 0 : index
    %31 = vector.load %arg3[%c0_16, %c0_17] : memref<1x256xf32, #tpu.memory_space<vmem>>, vector<1x256xf32>
    tpu.vector_store %arg3[%c0_16, %c0_17], %30 {strides = array<i32>} : memref<1x256xf32, #tpu.memory_space<vmem>>, vector<1x256xf32>,
    return
  }
  func.func @transform_0(%arg0: i32) -> (i32, i32) {
    %c0_i32 = arith.constant 0 : i32
    %c0_i32_0 = arith.constant 0 : i32
    %c0_i32_1 = arith.constant 0 : i32
    return %c0_i32, %c0_i32_0 : i32, i32
  }
  func.func @transform_1(%arg0: i32) -> (i32, i32) {
    %c0_i32 = arith.constant 0 : i32
    %c0_i32_0 = arith.constant 0 : i32
    return %arg0, %c0_i32 : i32, i32
  }
  func.func @transform_2(%arg0: i32) -> (i32, i32) {
    %c0_i32 = arith.constant 0 : i32
    %c0_i32_0 = arith.constant 0 : i32
    return %c0_i32, %arg0 : i32, i32
  }
}

</mosaic_0001>

<bundles_post_ra>
// kernel: tpu_custom_call.1
= control target key start
LH: loop header
LB: loop body
LE: loop exit
PB: predicated region body
PF: predicated region fallthrough
CT: control target
= control target key end

     0   :  { %7 = vsyncpa [#allocation3], 0  ;;  %s2016_s0 = inlined_call_operand.hbm [shape: f32[520,128], index: 0, kind: input, shape index: {}]   ;;  %s2017_s1 = inlined_call_operand.hbm [shape: f32[256,128], index: 1, kind: input, shape index: {}]   ;;  %s2018_s2 = inlined_call_operand.hbm [shape: f32[1,256], index: 2, kind: output, shape index: {}]  }
   0x1   :  { %8 = vsyncpa [#allocation6], 0 }
   0x2   :  { %9 = vsyncpa [#allocation4], 0  ;;  %s1767_s9 = smov [#allocation2]   ;;  %s1695_s13 = scalar_lea.hbm %s2016_s0, 8320 }
   0x3   :  { %s15_s10 = sshll.u32 %s1767_s9, 4  ;;  %p1696_p0 = scmp.ne.s32.totalorder %s2016_s0, %s1695_s13  ;;  %s16_s10 = int_to_ptr.vmem [resolvable:$true] %s15_s10 }
   0x4   :  { %p1699_p1 = scmp.lt.u32.totalorder %s1695_s13, %s2016_s0 }
   0x6   :  { %p1701_p2 = pnand %p1699_p1, %p1696_p0 }
   0x8   :  { %1704 = shalt.err (!%p1701_p2)
}
   0x9   :  { %s1705_s18 = scalar_lea.vmem %s16_s10, 8320  ;;  %p1710_p4 = scmp.lt.s32.totalorder %s16_s10, %s16_s10 }
   0xa   :  { %p1706_p3 = scmp.ne.s32.totalorder %s16_s10, %s1705_s18  ;;  %p1711_p5 = scmp.lt.s32.totalorder %s1705_s18, %s1705_s18 }
   0xc   :  { %p1712_p6 = por %p1711_p5, %p1710_p4 }
   0xe   :  { %p1713_p7 = pnand %p1712_p6, %p1706_p3 }
  0x10   :  { %1716 = shalt.err (!%p1713_p7)
}
  0x11   :  { %s1768_s19 = smov 128   ;;  %s1769_s20 = smov 8  }
  0x12   :  { %21 = dma.hbm_to_vmem [thread:$0]  %s2016_s0, 8320, %s16_s10, [#allocation3], %s1768_s19, %s1768_s19, %s1769_s20  }
  0x13   :  { %s1770_s23 = smov [#allocation5]   ;;  %s1717_s27 = scalar_lea.hbm %s2017_s1, 4096 }
  0x14   :  { %s27_s24 = sshll.u32 %s1770_s23, 4  ;;  %p1718_p8 = scmp.ne.s32.totalorder %s2017_s1, %s1717_s27  ;;  %s28_s24 = int_to_ptr.vmem [resolvable:$true] %s27_s24 }
  0x15   :  { %p1721_p9 = scmp.lt.u32.totalorder %s1717_s27, %s2017_s1 }
  0x17   :  { %p1723_p10 = pnand %p1721_p9, %p1718_p8 }
  0x19   :  { %1726 = shalt.err (!%p1723_p10)
}
  0x1a   :  { %s1727_s4 = scalar_lea.vmem %s28_s24, 4096  ;;  %p1732_p12 = scmp.lt.s32.totalorder %s28_s24, %s28_s24 }
  0x1b   :  { %p1728_p11 = scmp.ne.s32.totalorder %s28_s24, %s1727_s4  ;;  %p1733_p13 = scmp.lt.s32.totalorder %s1727_s4, %s1727_s4 }
  0x1d   :  { %p1734_p0 = por %p1733_p13, %p1732_p12 }
  0x1f   :  { %p1735_p1 = pnand %p1734_p0, %p1728_p11 }
  0x21   :  { %1738 = shalt.err (!%p1735_p1)
}
  0x22   :  { %33 = dma.hbm_to_vmem [thread:$0]  %s2017_s1, 4096, %s28_s24, [#allocation6], %s1768_s19, %s1768_s19, %s1769_s20  }
  0x23   :  { %1761 = dma.done.wait [#allocation3], 8320  }
  0x24   :  { %1762 = vsyncadd [#allocation3], 4294958976 }
  0x25   :  { %1763 = dma.done.wait [#allocation6], 4096  }
  0x26   :  { %1764 = vsyncadd [#allocation6], 4294963200  ;;  %v72_v0 = vld [vmem:[#allocation2] sm:$0xff]  ;;  %v73_v1 = vld [vmem:[#allocation2 + $0x8] sm:$0xff]  ;;  %s1773_s1 = smov [#allocation7]  }
  0x27   :  { %v74_v2 = vld [vmem:[#allocation2 + $0x10] sm:$0xff]  ;;  %v1574_v3 = vpack.c.bf16 %v73_v1, %v72_v0  ;;  %v75_v4 = vld [vmem:[#allocation2 + $0x18] sm:$0xff]  ;;  %v76_v6 = vld [vmem:[#allocation2 + $0x20] sm:$0xff]  ;;  %s1177_s6 = sshll.u32 %s1773_s1, 4  ;;  %s1178_s6 = int_to_ptr.vmem [resolvable:$true] %s1177_s6 }
  0x28   :  { %v1578_v5 = vpack.c.bf16 %v75_v4, %v74_v2  ;;  %v77_v7 = vld [vmem:[#allocation2 + $0x28] sm:$0xff]  ;;  %v78_v10 = vld [vmem:[#allocation2 + $0x30] sm:$0xff]  ;;  %v79_v11 = vld [vmem:[#allocation2 + $0x38] sm:$0xff]  ;;  %s1739_s7 = scalar_lea.vmem %s1178_s6, 32  ;;  %p1744_p3 = scmp.lt.s32.totalorder %s1178_s6, %s1178_s6 }
  0x29   :  { %1575 = vmatprep.subr.bf16.mxu0 %v1574_v3  ;;  %1670 = vmatprep.subr.bf16.mxu1 %v1574_v3  ;;  %v1582_v8 = vpack.c.bf16 %v77_v7, %v76_v6  ;;  %v40_v9 = vld [vmem:[#allocation5] sm:$0xff]  ;;  %v1586_v12 = vpack.c.bf16 %v79_v11, %v78_v10  ;;  %v80_v13 = vld [vmem:[#allocation2 + $0x40] sm:$0xff]  ;;  %v82_v17 = vld [vmem:[#allocation2 + $0x50] sm:$0xff]  ;;  %p1740_p2 = scmp.ne.s32.totalorder %s1178_s6, %s1739_s7  ;;  %p1745_p4 = scmp.lt.s32.totalorder %s1739_s7, %s1739_s7 }
  0x2a   :  { %1577 = vmatpush3.bf16.msra.mxu0 %v1574_v3  ;;  %1678 = vmatpush3.bf16.msra.mxu1 %v1574_v3  ;;  %v81_v14 = vld [vmem:[#allocation2 + $0x48] sm:$0xff]  ;;  %v83_v18 = vld [vmem:[#allocation2 + $0x58] sm:$0xff]  ;;  %v84_v20 = vld [vmem:[#allocation2 + $0x60] sm:$0xff] }
  0x2b   :  { %1579 = vmatprep.subr.bf16.mxu0 %v1578_v5  ;;  %1671 = vmatprep.subr.bf16.mxu1 %v1578_v5  ;;  %v56_v15 = vld [vmem:[#allocation5 + $0x80] sm:$0xff]  ;;  %v1590_v16 = vpack.c.bf16 %v81_v14, %v80_v13  ;;  %v1594_v19 = vpack.c.bf16 %v83_v18, %v82_v17  ;;  %v86_v23 = vld [vmem:[#allocation2 + $0x70] sm:$0xff]  ;;  %v87_v24 = vld [vmem:[#allocation2 + $0x78] sm:$0xff]  ;;  %p1746_p5 = por %p1745_p4, %p1744_p3 }
  0x2c   :  { %1366 = vmatprep.mubr.f32.mxu0 %v40_v9  ;;  %1390 = vmatprep.mubr.f32.mxu1 %v56_v15  ;;  %v85_v21 = vld [vmem:[#allocation2 + $0x68] sm:$0xff]  ;;  %v1602_v25 = vpack.c.bf16 %v87_v24, %v86_v23  ;;  %v350_v26 = vld [vmem:[#allocation2 + $0x80] sm:$0xff]  ;;  %v352_v29 = vld [vmem:[#allocation2 + $0x90] sm:$0xff] }
  0x2d   :  { %v1598_v22 = vpack.c.bf16 %v85_v21, %v84_v20  ;;  %v351_v27 = vld [vmem:[#allocation2 + $0x88] sm:$0xff]  ;;  %v353_v30 = vld [vmem:[#allocation2 + $0x98] sm:$0xff]  ;;  %v41_v31 = vld [vmem:[#allocation5 + $0x8] sm:$0xff]  ;;  %p1747_p6 = pnand %p1746_p5, %p1740_p2 }
  0x2e   :  { %1581 = vmatpush3.bf16.msra.mxu0 %v1578_v5  ;;  %1679 = vmatpush3.bf16.msra.mxu1 %v1578_v5  ;;  %v1606_v28 = vpack.c.bf16 %v351_v27, %v350_v26  ;;  %v57_v32 = vld [vmem:[#allocation5 + $0x88] sm:$0xff]  ;;  %v42_v33 = vld [vmem:[#allocation5 + $0x10] sm:$0xff]  ;;  %v1610_v35 = vpack.c.bf16 %v353_v30, %v352_v29  ;;  %v354_v36 = vld [vmem:[#allocation2 + $0xa0] sm:$0xff] }
  0x2f   :  { %1583 = vmatprep.subr.bf16.mxu0 %v1582_v8  ;;  %1672 = vmatprep.subr.bf16.mxu1 %v1582_v8  ;;  %v58_v34 = vld [vmem:[#allocation5 + $0x90] sm:$0xff]  ;;  %v355_v37 = vld [vmem:[#allocation2 + $0xa8] sm:$0xff]  ;;  %v43_v38 = vld [vmem:[#allocation5 + $0x18] sm:$0xff] }
  0x30   :  { %v59_v39 = vld [vmem:[#allocation5 + $0x98] sm:$0xff]  ;;  %v44_v40 = vld [vmem:[#allocation5 + $0x20] sm:$0xff]  ;;  %v1614_v42 = vpack.c.bf16 %v355_v37, %v354_v36  ;;  %v356_v43 = vld [vmem:[#allocation2 + $0xb0] sm:$0xff] }
  0x31   :  { %v60_v41 = vld [vmem:[#allocation5 + $0xa0] sm:$0xff]  ;;  %v357_v44 = vld [vmem:[#allocation2 + $0xb8] sm:$0xff]  ;;  %v45_v45 = vld [vmem:[#allocation5 + $0x28] sm:$0xff] }
  0x32   :  { %1585 = vmatpush3.bf16.msra.mxu0 %v1582_v8  ;;  %1680 = vmatpush3.bf16.msra.mxu1 %v1582_v8  ;;  %v61_v46 = vld [vmem:[#allocation5 + $0xa8] sm:$0xff]  ;;  %v46_v47 = vld [vmem:[#allocation5 + $0x30] sm:$0xff]  ;;  %v1618_v49 = vpack.c.bf16 %v357_v44, %v356_v43  ;;  %v358_v50 = vld [vmem:[#allocation2 + $0xc0] sm:$0xff] }
  0x33   :  { %1587 = vmatprep.subr.bf16.mxu0 %v1586_v12  ;;  %1673 = vmatprep.subr.bf16.mxu1 %v1586_v12  ;;  %v62_v48 = vld [vmem:[#allocation5 + $0xb0] sm:$0xff]  ;;  %v359_v51 = vld [vmem:[#allocation2 + $0xc8] sm:$0xff]  ;;  %v47_v52 = vld [vmem:[#allocation5 + $0x38] sm:$0xff] }
  0x34   :  { %v63_v53 = vld [vmem:[#allocation5 + $0xb8] sm:$0xff]  ;;  %v48_v54 = vld [vmem:[#allocation5 + $0x40] sm:$0xff]  ;;  %v1622_v56 = vpack.c.bf16 %v359_v51, %v358_v50  ;;  %v360_v57 = vld [vmem:[#allocation2 + $0xd0] sm:$0xff] }
  0x35   :  { %v64_v55 = vld [vmem:[#allocation5 + $0xc0] sm:$0xff]  ;;  %v361_v58 = vld [vmem:[#allocation2 + $0xd8] sm:$0xff]  ;;  %v49_v59 = vld [vmem:[#allocation5 + $0x48] sm:$0xff] }
  0x36   :  { %1589 = vmatpush3.bf16.msra.mxu0 %v1586_v12  ;;  %1681 = vmatpush3.bf16.msra.mxu1 %v1586_v12  ;;  %v65_v60 = vld [vmem:[#allocation5 + $0xc8] sm:$0xff]  ;;  %v50_v61 = vld [vmem:[#allocation5 + $0x50] sm:$0xff]  ;;  %v1626_v63 = vpack.c.bf16 %v361_v58, %v360_v57  ;;  %v362_v0 = vld [vmem:[#allocation2 + $0xe0] sm:$0xff] }
  0x37   :  { %1591 = vmatprep.subr.bf16.mxu0 %v1590_v16  ;;  %1674 = vmatprep.subr.bf16.mxu1 %v1590_v16  ;;  %v66_v62 = vld [vmem:[#allocation5 + $0xd0] sm:$0xff]  ;;  %v363_v1 = vld [vmem:[#allocation2 + $0xe8] sm:$0xff]  ;;  %v51_v2 = vld [vmem:[#allocation5 + $0x58] sm:$0xff] }
  0x38   :  { %v67_v3 = vld [vmem:[#allocation5 + $0xd8] sm:$0xff]  ;;  %v52_v4 = vld [vmem:[#allocation5 + $0x60] sm:$0xff]  ;;  %v1630_v6 = vpack.c.bf16 %v363_v1, %v362_v0  ;;  %v53_v7 = vld [vmem:[#allocation5 + $0x68] sm:$0xff] }
  0x39   :  { %v68_v5 = vld [vmem:[#allocation5 + $0xe0] sm:$0xff]  ;;  %v69_v8 = vld [vmem:[#allocation5 + $0xe8] sm:$0xff]  ;;  %v54_v9 = vld [vmem:[#allocation5 + $0x70] sm:$0xff] }
  0x3a   :  { %1593 = vmatpush3.bf16.msra.mxu0 %v1590_v16  ;;  %1682 = vmatpush3.bf16.msra.mxu1 %v1590_v16  ;;  %v70_v10 = vld [vmem:[#allocation5 + $0xf0] sm:$0xff]  ;;  %v55_v11 = vld [vmem:[#allocation5 + $0x78] sm:$0xff]  ;;  %v364_v13 = vld [vmem:[#allocation2 + $0xf0] sm:$0xff] }
  0x3b   :  { %1595 = vmatprep.subr.bf16.mxu0 %v1594_v19  ;;  %1675 = vmatprep.subr.bf16.mxu1 %v1594_v19  ;;  %v71_v12 = vld [vmem:[#allocation5 + $0xf8] sm:$0xff]  ;;  %v365_v14 = vld [vmem:[#allocation2 + $0xf8] sm:$0xff]  ;;  %v629_v17 = vld [vmem:[#allocation2 + $0x108] sm:$0xff] }
  0x3c   :  { %v1634_v15 = vpack.c.bf16 %v365_v14, %v364_v13  ;;  %v628_v16 = vld [vmem:[#allocation2 + $0x100] sm:$0xff]  ;;  %v630_v18 = vld [vmem:[#allocation2 + $0x110] sm:$0xff]  ;;  %v631_v20 = vld [vmem:[#allocation2 + $0x118] sm:$0xff] }
  0x3d   :  { %v1642_v21 = vpack.c.bf16 %v631_v20, %v630_v18  ;;  %v633_v23 = vld [vmem:[#allocation2 + $0x128] sm:$0xff]  ;;  %v635_v26 = vld [vmem:[#allocation2 + $0x138] sm:$0xff]  ;;  %v1813_v37 = vld [vmem:[#allocation2 + $0x200] ss:$0 sm:$0xff] }
  0x3e   :  { %1597 = vmatpush3.bf16.msra.mxu0 %v1594_v19  ;;  %1683 = vmatpush3.bf16.msra.mxu1 %v1594_v19  ;;  %v1638_v19 = vpack.c.bf16 %v629_v17, %v628_v16  ;;  %v637_v29 = vld [vmem:[#allocation2 + $0x148] sm:$0xff] }
  0x3f   :  { %1599 = vmatprep.subr.bf16.mxu0 %v1598_v22  ;;  %1676 = vmatprep.subr.bf16.mxu1 %v1598_v22 }
  0x42   :  { %1601 = vmatpush3.bf16.msra.mxu0 %v1598_v22  ;;  %1684 = vmatpush3.bf16.msra.mxu1 %v1598_v22  ;;  %v632_v22 = vld [vmem:[#allocation2 + $0x120] sm:$0xff] }
  0x43   :  { %1603 = vmatprep.subr.bf16.mxu0 %v1602_v25  ;;  %1677 = vmatprep.subr.bf16.mxu1 %v1602_v25  ;;  %v1646_v24 = vpack.c.bf16 %v633_v23, %v632_v22 }
  0x46   :  { %1605 = vmatpush3.bf16.msra.mxu0 %v1602_v25  ;;  %1685 = vmatpush3.bf16.msra.mxu1 %v1602_v25  ;;  %v634_v25 = vld [vmem:[#allocation2 + $0x130] sm:$0xff] }
  0x47   :  { %1607 = vmatprep.subr.bf16.mxu1 %v1606_v28  ;;  %1639 = vmatprep.subr.bf16.mxu0 %v1638_v19  ;;  %v1650_v27 = vpack.c.bf16 %v635_v26, %v634_v25 }
  0x49   :  { %1367 = vmatmul.mubr.f32.vlgmr.msra.gmra.mrb[0].mxu0 %v41_v31  ;;  %1391 = vmatmul.mubr.f32.vlgmr.msra.gmra.mrb[0].mxu1 %v57_v32  ;;  %v638_v31 = vld [vmem:[#allocation2 + $0x150] sm:$0xff]  ;;  %v639_v32 = vld [vmem:[#allocation2 + $0x158] sm:$0xff] }
  0x4a   :  { %1369 = vmatprep.mubr.f32.mxu0 %v42_v33  ;;  %1393 = vmatprep.mubr.f32.mxu1 %v58_v34  ;;  %v1658_v33 = vpack.c.bf16 %v639_v32, %v638_v31  ;;  %v640_v34 = vld [vmem:[#allocation2 + $0x160] sm:$0xff] }
  0x4b   :  { %1609 = vmatpush3.bf16.msra.mxu1 %v1606_v28  ;;  %1641 = vmatpush3.bf16.msra.mxu0 %v1638_v19  ;;  %v636_v28 = vld [vmem:[#allocation2 + $0x140] sm:$0xff] }
  0x4c   :  { %1611 = vmatprep.subr.bf16.mxu1 %v1610_v35  ;;  %1643 = vmatprep.subr.bf16.mxu0 %v1642_v21  ;;  %v1654_v30 = vpack.c.bf16 %v637_v29, %v636_v28 }
  0x4d   :  { %1370 = vmatmul.mubr.f32.gmra.mrb[2].mxu0 %v43_v38  ;;  %1394 = vmatmul.mubr.f32.gmra.mrb[2].mxu1 %v59_v39 }
  0x4e   :  { %1372 = vmatprep.mubr.f32.mxu0 %v44_v40  ;;  %1396 = vmatprep.mubr.f32.mxu1 %v60_v41 }
  0x4f   :  { %1613 = vmatpush3.bf16.msra.mxu1 %v1610_v35  ;;  %1645 = vmatpush3.bf16.msra.mxu0 %v1642_v21  ;;  %v641_v35 = vld [vmem:[#allocation2 + $0x168] sm:$0xff] }
  0x50   :  { %1615 = vmatprep.subr.bf16.mxu1 %v1614_v42  ;;  %1647 = vmatprep.subr.bf16.mxu0 %v1646_v24  ;;  %v1662_v36 = vpack.c.bf16 %v641_v35, %v640_v34 }
  0x51   :  { %1373 = vmatmul.mubr.f32.gmra.mrb[4].mxu0 %v45_v45  ;;  %1397 = vmatmul.mubr.f32.gmra.mrb[4].mxu1 %v61_v46 }
  0x52   :  { %1375 = vmatprep.mubr.f32.mxu0 %v46_v47  ;;  %1399 = vmatprep.mubr.f32.mxu1 %v62_v48 }
  0x53   :  { %1617 = vmatpush3.bf16.msra.mxu1 %v1614_v42  ;;  %1649 = vmatpush3.bf16.msra.mxu0 %v1646_v24 }
  0x54   :  { %1619 = vmatprep.subr.bf16.mxu1 %v1618_v49  ;;  %1651 = vmatprep.subr.bf16.mxu0 %v1650_v27 }
  0x55   :  { %1376 = vmatmul.mubr.f32.gmra.mrb[6].mxu0 %v47_v52  ;;  %1400 = vmatmul.mubr.f32.gmra.mrb[6].mxu1 %v63_v53 }
  0x56   :  { %1378 = vmatprep.mubr.f32.mxu0 %v48_v54  ;;  %1402 = vmatprep.mubr.f32.mxu1 %v64_v55 }
  0x57   :  { %1621 = vmatpush3.bf16.msra.mxu1 %v1618_v49  ;;  %1653 = vmatpush3.bf16.msra.mxu0 %v1650_v27 }
  0x58   :  { %1623 = vmatprep.subr.bf16.mxu1 %v1622_v56  ;;  %1655 = vmatprep.subr.bf16.mxu0 %v1654_v30 }
  0x59   :  { %1379 = vmatmul.mubr.f32.gmra.mrb[8].mxu0 %v49_v59  ;;  %1403 = vmatmul.mubr.f32.gmra.mrb[8].mxu1 %v65_v60 }
  0x5a   :  { %1381 = vmatprep.mubr.f32.mxu0 %v50_v61  ;;  %1405 = vmatprep.mubr.f32.mxu1 %v66_v62 }
  0x5b   :  { %1625 = vmatpush3.bf16.msra.mxu1 %v1622_v56  ;;  %1657 = vmatpush3.bf16.msra.mxu0 %v1654_v30 }
  0x5c   :  { %1627 = vmatprep.subr.bf16.mxu1 %v1626_v63  ;;  %1659 = vmatprep.subr.bf16.mxu0 %v1658_v33 }
  0x5d   :  { %1382 = vmatmul.mubr.f32.gmra.mrb[10].mxu0 %v51_v2  ;;  %1406 = vmatmul.mubr.f32.gmra.mrb[10].mxu1 %v67_v3 }
  0x5e   :  { %1384 = vmatprep.mubr.f32.mxu0 %v52_v4  ;;  %1408 = vmatprep.mubr.f32.mxu1 %v68_v5 }
  0x5f   :  { %1629 = vmatpush3.bf16.msra.mxu1 %v1626_v63  ;;  %1661 = vmatpush3.bf16.msra.mxu0 %v1658_v33 }
  0x60   :  { %1631 = vmatprep.subr.bf16.mxu1 %v1630_v6  ;;  %1663 = vmatprep.subr.bf16.mxu0 %v1662_v36 }
  0x61   :  { %1385 = vmatmul.mubr.f32.gmra.mrb[12].mxu0 %v53_v7  ;;  %1409 = vmatmul.mubr.f32.gmra.mrb[12].mxu1 %v69_v8 }
  0x62   :  { %1387 = vmatprep.mubr.f32.mxu0 %v54_v9  ;;  %1411 = vmatprep.mubr.f32.mxu1 %v70_v10 }
  0x63   :  { %1633 = vmatpush3.bf16.msra.mxu1 %v1630_v6  ;;  %1665 = vmatpush3.bf16.msra.mxu0 %v1662_v36 }
  0x64   :  { %1635 = vmatprep.subr.bf16.mxu1 %v1634_v15 }
  0x65   :  { %1388 = vmatmul.mubr.f32.gmra.mrb[14].mxu0 %v55_v11  ;;  %1412 = vmatmul.mubr.f32.gmra.mrb[14].mxu1 %v71_v12 }
  0x67   :  { %1637 = vmatpush3.bf16.msra.mxu1 %v1634_v15 }
 0x11c   :  { %v1368_v38 = vpop.f32.mrb[0].mxu0  ;;  %v1815_v39 = vpop.f32.mrb[0].mxu1 }
 0x11d   :  { %v165_v40 = vadd.f32 %v1368_v38, %v1813_v37  ;;  %v159_v41 = vpop.f32.mrb[1].mxu0  ;;  %v1818_v42 = vpop.f32.mrb[1].mxu1 }
 0x11e   :  { %v160_v43 = vadd.f32 %v1813_v37, %v159_v41  ;;  %v240_v31 = vadd.f32 %v1813_v37, %v1818_v42 }
 0x11f   :  { %v319_v47 = vmax.f32 %v165_v40, 0.0  ;;  %v245_v40 = vadd.f32 %v1815_v39, %v1813_v37 }
 0x120   :  { %v318_v44 = vmax.f32 %v160_v43, 0.0  ;;  %v1371_v45 = vpop.f32.mrb[2].mxu0  ;;  %v1821_v46 = vpop.f32.mrb[2].mxu1  ;;  %v334_v43 = vmax.f32 %v240_v31, 0.0 }
 0x121   :  { %v175_v48 = vadd.f32 %v1371_v45, %v1813_v37  ;;  %v169_v49 = vpop.f32.mrb[3].mxu0  ;;  %v1824_v50 = vpop.f32.mrb[3].mxu1  ;;  %v335_v42 = vmax.f32 %v245_v40, 0.0  ;;  %v255_v45 = vadd.f32 %v1821_v46, %v1813_v37 }
 0x122   :  { %v170_v51 = vadd.f32 %v1813_v37, %v169_v49  ;;  %1446 = vmatprep.mubr.f32.mxu1 %v318_v44  ;;  %v250_v44 = vadd.f32 %v1813_v37, %v1824_v50 }
 0x123   :  { %v321_v52 = vmax.f32 %v175_v48, 0.0  ;;  %1447 = vmatmul.mubr.f32.vlgmr.msra.gmra.mrb[16].mxu1 %v319_v47  ;;  %v337_v49 = vmax.f32 %v255_v45, 0.0 }
 0x124   :  { %v320_v53 = vmax.f32 %v170_v51, 0.0  ;;  %v1374_v54 = vpop.f32.mrb[4].mxu0  ;;  %v1827_v55 = vpop.f32.mrb[4].mxu1  ;;  %v336_v47 = vmax.f32 %v250_v44, 0.0 }
 0x125   :  { %v185_v56 = vadd.f32 %v1374_v54, %v1813_v37  ;;  %v179_v57 = vpop.f32.mrb[5].mxu0  ;;  %v1830_v58 = vpop.f32.mrb[5].mxu1  ;;  %v265_v39 = vadd.f32 %v1827_v55, %v1813_v37 }
 0x126   :  { %v180_v59 = vadd.f32 %v1813_v37, %v179_v57  ;;  %1449 = vmatprep.mubr.f32.mxu1 %v320_v53  ;;  %v260_v48 = vadd.f32 %v1813_v37, %v1830_v58 }
 0x127   :  { %v323_v60 = vmax.f32 %v185_v56, 0.0  ;;  %1450 = vmatmul.mubr.f32.gmra.mrb[18].mxu1 %v321_v52  ;;  %v339_v52 = vmax.f32 %v265_v39, 0.0 }
 0x128   :  { %v322_v61 = vmax.f32 %v180_v59, 0.0  ;;  %v1377_v62 = vpop.f32.mrb[6].mxu0  ;;  %v1833_v63 = vpop.f32.mrb[6].mxu1  ;;  %v338_v51 = vmax.f32 %v260_v48, 0.0 }
 0x129   :  { %v195_v0 = vadd.f32 %v1377_v62, %v1813_v37  ;;  %v189_v1 = vpop.f32.mrb[7].mxu0  ;;  %v269_v2 = vpop.f32.mrb[7].mxu1  ;;  %v275_v53 = vadd.f32 %v1833_v63, %v1813_v37 }
 0x12a   :  { %v190_v3 = vadd.f32 %v1813_v37, %v189_v1  ;;  %1452 = vmatprep.mubr.f32.mxu1 %v322_v61  ;;  %v270_v50 = vadd.f32 %v1813_v37, %v269_v2 }
 0x12b   :  { %v325_v4 = vmax.f32 %v195_v0, 0.0  ;;  %1453 = vmatmul.mubr.f32.gmra.mrb[20].mxu1 %v323_v60  ;;  %v341_v56 = vmax.f32 %v275_v53, 0.0 }
 0x12c   :  { %v324_v5 = vmax.f32 %v190_v3, 0.0  ;;  %v1380_v6 = vpop.f32.mrb[8].mxu0  ;;  %v1837_v7 = vpop.f32.mrb[8].mxu1  ;;  %v340_v46 = vmax.f32 %v270_v50, 0.0 }
 0x12d   :  { %v205_v8 = vadd.f32 %v1380_v6, %v1813_v37  ;;  %v199_v9 = vpop.f32.mrb[9].mxu0  ;;  %v279_v10 = vpop.f32.mrb[9].mxu1  ;;  %v285_v57 = vadd.f32 %v1837_v7, %v1813_v37  ;;  %v642_v7 = vld [vmem:[#allocation2 + $0x170] sm:$0xff] }
 0x12e   :  { %v200_v11 = vadd.f32 %v1813_v37, %v199_v9  ;;  %1455 = vmatprep.mubr.f32.mxu1 %v324_v5  ;;  %v280_v54 = vadd.f32 %v1813_v37, %v279_v10  ;;  %v970_v10 = vld [vmem:[#allocation2 + $0x180] sm:$0xff] }
 0x12f   :  { %v327_v12 = vmax.f32 %v205_v8, 0.0  ;;  %1456 = vmatmul.mubr.f32.gmra.mrb[22].mxu1 %v325_v4  ;;  %v343_v59 = vmax.f32 %v285_v57, 0.0  ;;  %v643_v8 = vld [vmem:[#allocation2 + $0x178] sm:$0xff] }
 0x130   :  { %v326_v13 = vmax.f32 %v200_v11, 0.0  ;;  %v1383_v14 = vpop.f32.mrb[10].mxu0  ;;  %v1407_v15 = vpop.f32.mrb[10].mxu1  ;;  %v342_v55 = vmax.f32 %v280_v54, 0.0  ;;  %v1666_v9 = vpack.c.bf16 %v643_v8, %v642_v7  ;;  %v1771_v11 = vmov 0  }
 0x131   :  { %v215_v16 = vadd.f32 %v1383_v14, %v1813_v37  ;;  %v209_v17 = vpop.f32.mrb[11].mxu0  ;;  %v289_v18 = vpop.f32.mrb[11].mxu1  ;;  %v295_v60 = vadd.f32 %v1407_v15, %v1813_v37  ;;  %1693 = vset.pattern.permute.xlu1 %v1771_v11  ;;  %v974_v14 = vld [vmem:[#allocation2 + $0x1a0] sm:$0xff]  ;;  %v975_v15 = vld [vmem:[#allocation2 + $0x1a8] sm:$0xff] }
 0x132   :  { %v210_v19 = vadd.f32 %v1813_v37, %v209_v17  ;;  %1458 = vmatprep.mubr.f32.mxu1 %v326_v13  ;;  %v290_v58 = vadd.f32 %v1813_v37, %v289_v18  ;;  %1667 = vmatprep.subr.bf16.mxu0 %v1666_v9  ;;  %v972_v13 = vld [vmem:[#allocation2 + $0x190] sm:$0xff]  ;;  %v977_v17 = vld [vmem:[#allocation2 + $0x1b8] sm:$0xff]  ;;  %v978_v18 = vld [vmem:[#allocation2 + $0x1c0] sm:$0xff] }
 0x133   :  { %v329_v20 = vmax.f32 %v215_v16, 0.0  ;;  %1459 = vmatmul.mubr.f32.gmra.mrb[24].mxu1 %v327_v12  ;;  %v345_v63 = vmax.f32 %v295_v60, 0.0  ;;  %1669 = vmatpush3.bf16.msra.mxu0 %v1666_v9  ;;  %v971_v12 = vld [vmem:[#allocation2 + $0x188] sm:$0xff]  ;;  %v976_v16 = vld [vmem:[#allocation2 + $0x1b0] sm:$0xff] }
 0x134   :  { %v328_v21 = vmax.f32 %v210_v19, 0.0  ;;  %v1386_v22 = vpop.f32.mrb[12].mxu0  ;;  %v1410_v23 = vpop.f32.mrb[12].mxu1  ;;  %v344_v61 = vmax.f32 %v290_v58, 0.0  ;;  %989 = vperm.xlu1 %1693, %v970_v10   ;;  %v979_v19 = vld [vmem:[#allocation2 + $0x1c8] sm:$0xff] }
 0x135   :  { %v225_v24 = vadd.f32 %v1386_v22, %v1813_v37  ;;  %v219_v25 = vpop.f32.mrb[13].mxu0  ;;  %v299_v26 = vpop.f32.mrb[13].mxu1  ;;  %v305_v0 = vadd.f32 %v1410_v23, %v1813_v37  ;;  %v982_v22 = vld [vmem:[#allocation2 + $0x1e0] sm:$0xff]  ;;  %v983_v23 = vld [vmem:[#allocation2 + $0x1e8] sm:$0xff] }
 0x136   :  { %v220_v27 = vadd.f32 %v1813_v37, %v219_v25  ;;  %1461 = vmatprep.mubr.f32.mxu1 %v328_v21  ;;  %v300_v62 = vadd.f32 %v1813_v37, %v299_v26  ;;  %v981_v21 = vld [vmem:[#allocation2 + $0x1d8] sm:$0xff]  ;;  %v1872_v25 = vld [vmem:[#allocation2 + $0x201] ss:$0 sm:$0xff] }
 0x137   :  { %v331_v28 = vmax.f32 %v225_v24, 0.0  ;;  %1462 = vmatmul.mubr.f32.gmra.mrb[26].mxu1 %v329_v20  ;;  %v347_v3 = vmax.f32 %v305_v0, 0.0  ;;  %v980_v20 = vld [vmem:[#allocation2 + $0x1d0] sm:$0xff] }
 0x138   :  { %v330_v29 = vmax.f32 %v220_v27, 0.0  ;;  %v1389_v30 = vpop.f32.mrb[14].mxu0  ;;  %v1413_v32 = vpop.f32.mrb[14].mxu1  ;;  %v346_v1 = vmax.f32 %v300_v62, 0.0  ;;  %994 = vperm.xlu1 %1693, %v971_v12   ;;  %v984_v24 = vld [vmem:[#allocation2 + $0x1f0] sm:$0xff] }
 0x139   :  { %v235_v33 = vadd.f32 %v1389_v30, %v1813_v37  ;;  %v229_v34 = vpop.f32.mrb[15].mxu0  ;;  %v309_v35 = vpop.f32.mrb[15].mxu1  ;;  %v315_v4 = vadd.f32 %v1413_v32, %v1813_v37 }
 0x13a   :  { %v230_v36 = vadd.f32 %v1813_v37, %v229_v34  ;;  %1464 = vmatprep.mubr.f32.mxu1 %v330_v29  ;;  %v310_v2 = vadd.f32 %v1813_v37, %v309_v35  ;;  %v973_v37 = vld [vmem:[#allocation2 + $0x198] sm:$0xff] }
 0x13b   :  { %v333_v38 = vmax.f32 %v235_v33, 0.0  ;;  %1465 = vmatmul.mubr.f32.gmra.mrb[28].mxu1 %v331_v28  ;;  %v349_v6 = vmax.f32 %v315_v4, 0.0 }
 0x13c   :  { %v332_v41 = vmax.f32 %v230_v36, 0.0  ;;  %v348_v5 = vmax.f32 %v310_v2, 0.0  ;;  %999 = vperm.xlu1 %1693, %v972_v13  }
 0x13e   :  { %1467 = vmatprep.mubr.f32.mxu1 %v332_v41 }
 0x13f   :  { %1468 = vmatmul.mubr.f32.gmra.mrb[30].mxu1 %v333_v38 }
 0x140   :  { %1470 = vmatprep.mubr.f32.mxu1 %v334_v43  ;;  %1004 = vperm.xlu1 %1693, %v973_v37  }
 0x143   :  { %1471 = vmatmul.mubr.f32.gmra.mrb[32].mxu1 %v335_v42 }
 0x144   :  { %1473 = vmatprep.mubr.f32.mxu1 %v336_v47  ;;  %1009 = vperm.xlu1 %1693, %v974_v14  }
 0x147   :  { %1474 = vmatmul.mubr.f32.gmra.mrb[34].mxu1 %v337_v49 }
 0x148   :  { %1476 = vmatprep.mubr.f32.mxu1 %v338_v51  ;;  %1014 = vperm.xlu1 %1693, %v975_v15  }
 0x14b   :  { %1477 = vmatmul.mubr.f32.gmra.mrb[36].mxu1 %v339_v52 }
 0x14c   :  { %1479 = vmatprep.mubr.f32.mxu1 %v340_v46  ;;  %1019 = vperm.xlu1 %1693, %v976_v16  }
 0x14f   :  { %1480 = vmatmul.mubr.f32.gmra.mrb[38].mxu1 %v341_v56 }
 0x150   :  { %1482 = vmatprep.mubr.f32.mxu1 %v342_v55  ;;  %1024 = vperm.xlu1 %1693, %v977_v17  }
 0x153   :  { %1483 = vmatmul.mubr.f32.gmra.mrb[40].mxu1 %v343_v59 }
 0x154   :  { %1485 = vmatprep.mubr.f32.mxu1 %v344_v61  ;;  %1029 = vperm.xlu1 %1693, %v978_v18  }
 0x157   :  { %1486 = vmatmul.mubr.f32.gmra.mrb[42].mxu1 %v345_v63 }
 0x158   :  { %1488 = vmatprep.mubr.f32.mxu1 %v346_v1  ;;  %1034 = vperm.xlu1 %1693, %v979_v19  }
 0x15b   :  { %1489 = vmatmul.mubr.f32.gmra.mrb[44].mxu1 %v347_v3 }
 0x15c   :  { %1491 = vmatprep.mubr.f32.mxu1 %v348_v5  ;;  %1039 = vperm.xlu1 %1693, %v980_v20  }
 0x15f   :  { %1492 = vmatmul.mubr.f32.gmra.mrb[46].mxu1 %v349_v6 }
 0x160   :  { %1044 = vperm.xlu1 %1693, %v981_v21  }
 0x164   :  { %1049 = vperm.xlu1 %1693, %v982_v22  }
 0x168   :  { %1054 = vperm.xlu1 %1693, %v983_v23  }
 0x16c   :  { %1059 = vperm.xlu1 %1693, %v984_v24  }
 0x1f6   :  { %v1448_v26 = vpop.f32.mrb[16].mxu1 }
 0x1f7   :  { %v443_v27 = vadd.f32 %v1448_v26, %v1872_v25  ;;  %v437_v28 = vpop.f32.mrb[17].mxu1 }
 0x1f8   :  { %v438_v29 = vadd.f32 %v1872_v25, %v437_v28 }
 0x1f9   :  { %v597_v32 = vmax.f32 %v443_v27, 0.0 }
 0x1fa   :  { %v596_v30 = vmax.f32 %v438_v29, 0.0  ;;  %v1451_v31 = vpop.f32.mrb[18].mxu1 }
 0x1fb   :  { %v453_v33 = vadd.f32 %v1451_v31, %v1872_v25  ;;  %v447_v34 = vpop.f32.mrb[19].mxu1 }
 0x1fc   :  { %v448_v35 = vadd.f32 %v1872_v25, %v447_v34  ;;  %1526 = vmatprep.mubr.f32.mxu0 %v596_v30 }
 0x1fd   :  { %v599_v36 = vmax.f32 %v453_v33, 0.0  ;;  %1527 = vmatmul.mubr.f32.vlgmr.msra.gmra.mrb[16].mxu0 %v597_v32 }
 0x1fe   :  { %v598_v38 = vmax.f32 %v448_v35, 0.0  ;;  %v1454_v40 = vpop.f32.mrb[20].mxu1 }
 0x1ff   :  { %v463_v41 = vadd.f32 %v1454_v40, %v1872_v25  ;;  %v457_v43 = vpop.f32.mrb[21].mxu1 }
 0x200   :  { %v458_v44 = vadd.f32 %v1872_v25, %v457_v43  ;;  %1529 = vmatprep.mubr.f32.mxu0 %v598_v38 }
 0x201   :  { %v601_v42 = vmax.f32 %v463_v41, 0.0  ;;  %1530 = vmatmul.mubr.f32.gmra.mrb[18].mxu0 %v599_v36 }
 0x202   :  { %v600_v45 = vmax.f32 %v458_v44, 0.0  ;;  %v1457_v47 = vpop.f32.mrb[22].mxu1 }
 0x203   :  { %v473_v48 = vadd.f32 %v1457_v47, %v1872_v25  ;;  %v467_v49 = vpop.f32.mrb[23].mxu1 }
 0x204   :  { %v468_v39 = vadd.f32 %v1872_v25, %v467_v49  ;;  %1532 = vmatprep.mubr.f32.mxu0 %v600_v45 }
 0x205   :  { %v603_v51 = vmax.f32 %v473_v48, 0.0  ;;  %1533 = vmatmul.mubr.f32.gmra.mrb[20].mxu0 %v601_v42 }
 0x206   :  { %v602_v50 = vmax.f32 %v468_v39, 0.0  ;;  %v1460_v52 = vpop.f32.mrb[24].mxu1 }
 0x207   :  { %v483_v53 = vadd.f32 %v1460_v52, %v1872_v25  ;;  %v477_v46 = vpop.f32.mrb[25].mxu1 }
 0x208   :  { %v478_v54 = vadd.f32 %v1872_v25, %v477_v46  ;;  %1535 = vmatprep.mubr.f32.mxu0 %v602_v50 }
 0x209   :  { %v605_v56 = vmax.f32 %v483_v53, 0.0  ;;  %1536 = vmatmul.mubr.f32.gmra.mrb[22].mxu0 %v603_v51 }
 0x20a   :  { %v604_v57 = vmax.f32 %v478_v54, 0.0  ;;  %v1463_v55 = vpop.f32.mrb[26].mxu1 }
 0x20b   :  { %v493_v58 = vadd.f32 %v1463_v55, %v1872_v25  ;;  %v487_v59 = vpop.f32.mrb[27].mxu1 }
 0x20c   :  { %v488_v60 = vadd.f32 %v1872_v25, %v487_v59  ;;  %1538 = vmatprep.mubr.f32.mxu0 %v604_v57 }
 0x20d   :  { %v607_v61 = vmax.f32 %v493_v58, 0.0  ;;  %1539 = vmatmul.mubr.f32.gmra.mrb[24].mxu0 %v605_v56 }
 0x20e   :  { %v606_v62 = vmax.f32 %v488_v60, 0.0  ;;  %v1466_v63 = vpop.f32.mrb[28].mxu1 }
 0x20f   :  { %v503_v0 = vadd.f32 %v1466_v63, %v1872_v25  ;;  %v497_v1 = vpop.f32.mrb[29].mxu1 }
 0x210   :  { %v498_v2 = vadd.f32 %v1872_v25, %v497_v1  ;;  %1541 = vmatprep.mubr.f32.mxu0 %v606_v62 }
 0x211   :  { %v609_v3 = vmax.f32 %v503_v0, 0.0  ;;  %1542 = vmatmul.mubr.f32.gmra.mrb[26].mxu0 %v607_v61  ;;  %v1906_v61 = vld [vmem:[#allocation2 + $0x202] ss:$0 sm:$0xff] }
 0x212   :  { %v608_v4 = vmax.f32 %v498_v2, 0.0  ;;  %v1469_v5 = vpop.f32.mrb[30].mxu1 }
 0x213   :  { %v513_v6 = vadd.f32 %v1469_v5, %v1872_v25  ;;  %v507_v7 = vpop.f32.mrb[31].mxu1 }
 0x214   :  { %v508_v8 = vadd.f32 %v1872_v25, %v507_v7  ;;  %1544 = vmatprep.mubr.f32.mxu0 %v608_v4 }
 0x215   :  { %v611_v9 = vmax.f32 %v513_v6, 0.0  ;;  %1545 = vmatmul.mubr.f32.gmra.mrb[28].mxu0 %v609_v3 }
 0x216   :  { %v610_v10 = vmax.f32 %v508_v8, 0.0  ;;  %v1472_v12 = vpop.f32.mrb[32].mxu1 }
 0x217   :  { %v523_v13 = vadd.f32 %v1472_v12, %v1872_v25  ;;  %v517_v37 = vpop.f32.mrb[33].mxu1 }
 0x218   :  { %v518_v14 = vadd.f32 %v1872_v25, %v517_v37  ;;  %1547 = vmatprep.mubr.f32.mxu0 %v610_v10 }
 0x219   :  { %v613_v15 = vmax.f32 %v523_v13, 0.0  ;;  %1548 = vmatmul.mubr.f32.gmra.mrb[30].mxu0 %v611_v9 }
 0x21a   :  { %v612_v16 = vmax.f32 %v518_v14, 0.0  ;;  %v1475_v17 = vpop.f32.mrb[34].mxu1 }
 0x21b   :  { %v533_v18 = vadd.f32 %v1475_v17, %v1872_v25  ;;  %v527_v19 = vpop.f32.mrb[35].mxu1 }
 0x21c   :  { %1550 = vmatprep.mubr.f32.mxu0 %v612_v16  ;;  %v528_v20 = vadd.f32 %v1872_v25, %v527_v19 }
 0x21d   :  { %1551 = vmatmul.mubr.f32.gmra.mrb[32].mxu0 %v613_v15  ;;  %v615_v21 = vmax.f32 %v533_v18, 0.0 }
 0x21e   :  { %v614_v22 = vmax.f32 %v528_v20, 0.0  ;;  %v1478_v23 = vpop.f32.mrb[36].mxu1 }
 0x21f   :  { %v543_v24 = vadd.f32 %v1478_v23, %v1872_v25  ;;  %v537_v26 = vpop.f32.mrb[37].mxu1 }
 0x220   :  { %1553 = vmatprep.mubr.f32.mxu0 %v614_v22  ;;  %v538_v27 = vadd.f32 %v1872_v25, %v537_v26 }
 0x221   :  { %1554 = vmatmul.mubr.f32.gmra.mrb[34].mxu0 %v615_v21  ;;  %v617_v28 = vmax.f32 %v543_v24, 0.0 }
 0x222   :  { %v616_v29 = vmax.f32 %v538_v27, 0.0  ;;  %v1481_v30 = vpop.f32.mrb[38].mxu1 }
 0x223   :  { %v553_v31 = vadd.f32 %v1481_v30, %v1872_v25  ;;  %v547_v32 = vpop.f32.mrb[39].mxu1 }
 0x224   :  { %1556 = vmatprep.mubr.f32.mxu0 %v616_v29  ;;  %v548_v33 = vadd.f32 %v1872_v25, %v547_v32 }
 0x225   :  { %1557 = vmatmul.mubr.f32.gmra.mrb[36].mxu0 %v617_v28  ;;  %v619_v34 = vmax.f32 %v553_v31, 0.0 }
 0x226   :  { %v618_v35 = vmax.f32 %v548_v33, 0.0  ;;  %v1484_v36 = vpop.f32.mrb[40].mxu1 }
 0x227   :  { %v563_v38 = vadd.f32 %v1484_v36, %v1872_v25  ;;  %v557_v40 = vpop.f32.mrb[41].mxu1 }
 0x228   :  { %1559 = vmatprep.mubr.f32.mxu0 %v618_v35  ;;  %v558_v41 = vadd.f32 %v1872_v25, %v557_v40 }
 0x229   :  { %1560 = vmatmul.mubr.f32.gmra.mrb[38].mxu0 %v619_v34  ;;  %v621_v43 = vmax.f32 %v563_v38, 0.0 }
 0x22a   :  { %v620_v44 = vmax.f32 %v558_v41, 0.0  ;;  %v1487_v42 = vpop.f32.mrb[42].mxu1 }
 0x22b   :  { %v573_v45 = vadd.f32 %v1487_v42, %v1872_v25  ;;  %v567_v47 = vpop.f32.mrb[43].mxu1 }
 0x22c   :  { %1562 = vmatprep.mubr.f32.mxu0 %v620_v44  ;;  %v568_v48 = vadd.f32 %v1872_v25, %v567_v47 }
 0x22d   :  { %1563 = vmatmul.mubr.f32.gmra.mrb[40].mxu0 %v621_v43  ;;  %v623_v49 = vmax.f32 %v573_v45, 0.0 }
 0x22e   :  { %v622_v39 = vmax.f32 %v568_v48, 0.0  ;;  %v1490_v51 = vpop.f32.mrb[44].mxu1 }
 0x22f   :  { %v583_v50 = vadd.f32 %v1490_v51, %v1872_v25  ;;  %v577_v52 = vpop.f32.mrb[45].mxu1 }
 0x230   :  { %1565 = vmatprep.mubr.f32.mxu0 %v622_v39  ;;  %v578_v53 = vadd.f32 %v1872_v25, %v577_v52 }
 0x231   :  { %1566 = vmatmul.mubr.f32.gmra.mrb[42].mxu0 %v623_v49  ;;  %v625_v46 = vmax.f32 %v583_v50, 0.0 }
 0x232   :  { %v624_v54 = vmax.f32 %v578_v53, 0.0  ;;  %v1493_v56 = vpop.f32.mrb[46].mxu1 }
 0x233   :  { %v593_v57 = vadd.f32 %v1493_v56, %v1872_v25  ;;  %v587_v55 = vpop.f32.mrb[47].mxu1 }
 0x234   :  { %1568 = vmatprep.mubr.f32.mxu0 %v624_v54  ;;  %v588_v58 = vadd.f32 %v1872_v25, %v587_v55 }
 0x235   :  { %1569 = vmatmul.mubr.f32.gmra.mrb[44].mxu0 %v625_v46  ;;  %v627_v59 = vmax.f32 %v593_v57, 0.0 }
 0x236   :  { %v626_v60 = vmax.f32 %v588_v58, 0.0 }
 0x238   :  { %1571 = vmatprep.mubr.f32.mxu0 %v626_v60 }
 0x239   :  { %1572 = vmatmul.mubr.f32.gmra.mrb[46].mxu0 %v627_v59 }
 0x2d0   :  { %v1528_v62 = vpop.f32.mrb[16].mxu0 }
 0x2d1   :  { %v715_v63 = vpop.f32.mrb[17].mxu0  ;;  %v721_v1 = vadd.f32 %v1528_v62, %v1906_v61 }
 0x2d2   :  { %v716_v0 = vadd.f32 %v1906_v61, %v715_v63 }
 0x2d3   :  { %v875_v5 = vmax.f32 %v721_v1, 0.0 }
 0x2d4   :  { %v1531_v2 = vpop.f32.mrb[18].mxu0  ;;  %v874_v3 = vmax.f32 %v716_v0, 0.0 }
 0x2d5   :  { %v725_v4 = vpop.f32.mrb[19].mxu0  ;;  %v731_v8 = vadd.f32 %v1531_v2, %v1906_v61 }
 0x2d6   :  { %906 = vxpose.xlu0.b32.start [1/16] %v874_v3, 128  ;;  %v726_v25 = vadd.f32 %v1906_v61, %v725_v4 }
 0x2d7   :  { %v877_v13 = vmax.f32 %v731_v8, 0.0 }
 0x2d8   :  { %v1534_v6 = vpop.f32.mrb[20].mxu0  ;;  %v876_v9 = vmax.f32 %v726_v25, 0.0 }
 0x2d9   :  { %v735_v7 = vpop.f32.mrb[21].mxu0  ;;  %v741_v16 = vadd.f32 %v1534_v6, %v1906_v61 }
 0x2da   :  { %907 = vxpose.xlu0.b32.cont [2/16] %v875_v5, 128  ;;  %v736_v37 = vadd.f32 %v1906_v61, %v735_v7 }
 0x2db   :  { %v879_v20 = vmax.f32 %v741_v16, 0.0 }
 0x2dc   :  { %v1537_v10 = vpop.f32.mrb[22].mxu0  ;;  %v878_v17 = vmax.f32 %v736_v37, 0.0 }
 0x2dd   :  { %v745_v12 = vpop.f32.mrb[23].mxu0  ;;  %v751_v24 = vadd.f32 %v1537_v10, %v1906_v61 }
 0x2de   :  { %908 = vxpose.xlu0.b32.cont [3/16] %v876_v9, 128  ;;  %v746_v21 = vadd.f32 %v1906_v61, %v745_v12 }
 0x2df   :  { %v881_v29 = vmax.f32 %v751_v24, 0.0 }
 0x2e0   :  { %v1540_v14 = vpop.f32.mrb[24].mxu0  ;;  %v880_v26 = vmax.f32 %v746_v21, 0.0 }
 0x2e1   :  { %v755_v15 = vpop.f32.mrb[25].mxu0  ;;  %v761_v35 = vadd.f32 %v1540_v14, %v1906_v61 }
 0x2e2   :  { %909 = vxpose.xlu0.b32.cont [4/16] %v877_v13, 128  ;;  %v756_v30 = vadd.f32 %v1906_v61, %v755_v15 }
 0x2e3   :  { %v883_v42 = vmax.f32 %v761_v35, 0.0 }
 0x2e4   :  { %v1543_v18 = vpop.f32.mrb[26].mxu0  ;;  %v882_v36 = vmax.f32 %v756_v30, 0.0 }
 0x2e5   :  { %v765_v19 = vpop.f32.mrb[27].mxu0  ;;  %v771_v51 = vadd.f32 %v1543_v18, %v1906_v61 }
 0x2e6   :  { %910 = vxpose.xlu0.b32.cont [5/16] %v878_v17, 128  ;;  %v766_v45 = vadd.f32 %v1906_v61, %v765_v19 }
 0x2e7   :  { %v885_v56 = vmax.f32 %v771_v51, 0.0 }
 0x2e8   :  { %v1546_v22 = vpop.f32.mrb[28].mxu0  ;;  %v884_v50 = vmax.f32 %v766_v45, 0.0 }
 0x2e9   :  { %v775_v23 = vpop.f32.mrb[29].mxu0  ;;  %v781_v0 = vadd.f32 %v1546_v22, %v1906_v61 }
 0x2ea   :  { %911 = vxpose.xlu0.b32.cont [6/16] %v879_v20, 128  ;;  %v776_v57 = vadd.f32 %v1906_v61, %v775_v23 }
 0x2eb   :  { %v887_v7 = vmax.f32 %v781_v0, 0.0 }
 0x2ec   :  { %v1916_v27 = vpop.f32.mrb[30].mxu0  ;;  %v886_v1 = vmax.f32 %v776_v57, 0.0 }
 0x2ed   :  { %v785_v28 = vpop.f32.mrb[31].mxu0  ;;  %v791_v15 = vadd.f32 %v1916_v27, %v1906_v61 }
 0x2ee   :  { %912 = vxpose.xlu0.b32.cont [7/16] %v880_v26, 128  ;;  %v786_v8 = vadd.f32 %v1906_v61, %v785_v28  ;;  %v1943_v28 = vpop.permute.xlu1 %989 }
 0x2ef   :  { %v889_v22 = vmax.f32 %v791_v15, 0.0 }
 0x2f0   :  { %v1552_v31 = vpop.f32.mrb[32].mxu0  ;;  %v888_v16 = vmax.f32 %v786_v8, 0.0 }
 0x2f1   :  { %v795_v32 = vpop.f32.mrb[33].mxu0  ;;  %v801_v33 = vadd.f32 %v1552_v31, %v1906_v61 }
 0x2f2   :  { %v796_v34 = vadd.f32 %v1906_v61, %v795_v32  ;;  %913 = vxpose.xlu0.b32.cont [8/16] %v881_v29, 128  ;;  %v1945_v30 = vpop.permute.xlu1 %994 }
 0x2f3   :  { %v891_v43 = vmax.f32 %v801_v33, 0.0 }
 0x2f4   :  { %v890_v38 = vmax.f32 %v796_v34, 0.0  ;;  %v1555_v40 = vpop.f32.mrb[34].mxu0 }
 0x2f5   :  { %v805_v41 = vpop.f32.mrb[35].mxu0  ;;  %v811_v49 = vadd.f32 %v1555_v40, %v1906_v61  ;;  %v986_v40 = vld [vmem:[#allocation2 + $0x203] sm:$0x1] }
 0x2f6   :  { %938 = vxpose.xlu1.b32.start [1/16] %v890_v38, 128  ;;  %914 = vxpose.xlu0.b32.cont [9/16] %v882_v36, 128  ;;  %v806_v44 = vadd.f32 %v1906_v61, %v805_v41  ;;  %v1947_v32 = vpop.permute.xlu1 %999  ;;  %v985_v36 = vld [vmem:[#allocation2 + $0x1f8] sm:$0xff] }
 0x2f7   :  { %v893_v46 = vmax.f32 %v811_v49, 0.0 }
 0x2f8   :  { %v1558_v47 = vpop.f32.mrb[36].mxu0  ;;  %v892_v39 = vmax.f32 %v806_v44, 0.0 }
 0x2f9   :  { %v815_v48 = vpop.f32.mrb[37].mxu0  ;;  %v821_v60 = vadd.f32 %v1558_v47, %v1906_v61 }
 0x2fa   :  { %939 = vxpose.xlu1.b32.cont [2/16] %v891_v43, 128  ;;  %915 = vxpose.xlu0.b32.cont [10/16] %v883_v42, 128  ;;  %v816_v54 = vadd.f32 %v1906_v61, %v815_v48  ;;  %v1949_v34 = vpop.permute.xlu1 %1004 }
 0x2fb   :  { %v895_v5 = vmax.f32 %v821_v60, 0.0 }
 0x2fc   :  { %v1561_v52 = vpop.f32.mrb[38].mxu0  ;;  %v894_v62 = vmax.f32 %v816_v54, 0.0 }
 0x2fd   :  { %v825_v53 = vpop.f32.mrb[39].mxu0  ;;  %v831_v13 = vadd.f32 %v1561_v52, %v1906_v61 }
 0x2fe   :  { %940 = vxpose.xlu1.b32.cont [3/16] %v892_v39, 128  ;;  %916 = vxpose.xlu0.b32.cont [11/16] %v884_v50, 128  ;;  %v826_v25 = vadd.f32 %v1906_v61, %v825_v53  ;;  %v1951_v35 = vpop.permute.xlu1 %1009 }
 0x2ff   :  { %v897_v20 = vmax.f32 %v831_v13, 0.0 }
 0x300   :  { %v1564_v55 = vpop.f32.mrb[40].mxu0  ;;  %v896_v37 = vmax.f32 %v826_v25, 0.0 }
 0x301   :  { %v841_v58 = vadd.f32 %v1564_v55, %v1906_v61  ;;  %v835_v59 = vpop.f32.mrb[41].mxu0 }
 0x302   :  { %941 = vxpose.xlu1.b32.cont [4/16] %v893_v46, 128  ;;  %917 = vxpose.xlu0.b32.cont [12/16] %v885_v56, 128  ;;  %v836_v63 = vadd.f32 %v1906_v61, %v835_v59  ;;  %v1954_v38 = vpop.permute.xlu1 %1014 }
 0x303   :  { %v899_v24 = vmax.f32 %v841_v58, 0.0 }
 0x304   :  { %v1567_v2 = vpop.f32.mrb[42].mxu0  ;;  %v898_v23 = vmax.f32 %v836_v63, 0.0 }
 0x305   :  { %v851_v3 = vadd.f32 %v1567_v2, %v1906_v61  ;;  %v845_v4 = vpop.f32.mrb[43].mxu0 }
 0x306   :  { %942 = vxpose.xlu1.b32.cont [5/16] %v894_v62, 128  ;;  %918 = vxpose.xlu0.b32.cont [13/16] %v886_v1, 128  ;;  %v846_v6 = vadd.f32 %v1906_v61, %v845_v4  ;;  %v1956_v41 = vpop.permute.xlu1 %1019 }
 0x307   :  { %v901_v27 = vmax.f32 %v851_v3, 0.0 }
 0x308   :  { %v1570_v9 = vpop.f32.mrb[44].mxu0  ;;  %v900_v26 = vmax.f32 %v846_v6, 0.0 }
 0x309   :  { %v861_v10 = vadd.f32 %v1570_v9, %v1906_v61  ;;  %v855_v12 = vpop.f32.mrb[45].mxu0 }
 0x30a   :  { %943 = vxpose.xlu1.b32.cont [6/16] %v895_v5, 128  ;;  %919 = vxpose.xlu0.b32.cont [14/16] %v887_v7, 128  ;;  %v856_v14 = vadd.f32 %v1906_v61, %v855_v12  ;;  %v1958_v43 = vpop.permute.xlu1 %1024 }
 0x30b   :  { %v903_v31 = vmax.f32 %v861_v10, 0.0 }
 0x30c   :  { %v1573_v17 = vpop.f32.mrb[46].mxu0  ;;  %v902_v29 = vmax.f32 %v856_v14, 0.0 }
 0x30d   :  { %v871_v18 = vadd.f32 %v1573_v17, %v1906_v61  ;;  %v865_v19 = vpop.f32.mrb[47].mxu0 }
 0x30e   :  { %944 = vxpose.xlu1.b32.cont [7/16] %v896_v37, 128  ;;  %920 = vxpose.xlu0.b32.cont [15/16] %v888_v16, 128  ;;  %v866_v21 = vadd.f32 %v1906_v61, %v865_v19  ;;  %v1960_v44 = vpop.permute.xlu1 %1029 }
 0x30f   :  { %v905_v33 = vmax.f32 %v871_v18, 0.0 }
 0x310   :  { %v904_v61 = vmax.f32 %v866_v21, 0.0 }
 0x312   :  { %945 = vxpose.xlu1.b32.cont [8/16] %v897_v20, 128  ;;  %921 = vxpose.xlu0.b32.end [16/16] %v889_v22, 128  ;;  %v1962_v42 = vpop.permute.xlu1 %1034 }
 0x316   :  { %946 = vxpose.xlu1.b32.cont [9/16] %v898_v23, 128  ;;  %v1964_v47 = vpop.permute.xlu1 %1039 }
 0x31a   :  { %947 = vxpose.xlu1.b32.cont [10/16] %v899_v24, 128  ;;  %v1966_v39 = vpop.permute.xlu1 %1044 }
 0x31e   :  { %948 = vxpose.xlu1.b32.cont [11/16] %v900_v26, 128  ;;  %v1968_v51 = vpop.permute.xlu1 %1049 }
 0x322   :  { %949 = vxpose.xlu1.b32.cont [12/16] %v901_v27, 128  ;;  %v1970_v53 = vpop.permute.xlu1 %1054 }
 0x326   :  { %950 = vxpose.xlu1.b32.cont [13/16] %v902_v29, 128  ;;  %v1973_v56 = vpop.permute.xlu1 %1059 }
 0x32a   :  { %951 = vxpose.xlu1.b32.cont [14/16] %v903_v31, 128 }
 0x32e   :  { %952 = vxpose.xlu1.b32.cont [15/16] %v904_v61, 128 }
 0x332   :  { %953 = vxpose.xlu1.b32.end [16/16] %v905_v33, 128 }
 0x33b   :  { %1694 = vset.pattern.permute.xlu0 %v1771_v11 }
 0x33c   :  { %1064 = vperm.xlu0 %1694, %v985_v36  }
 0x340   :  { %1143 = vperm.xlu0 %1694, %v986_v40  }
 0x356   :  { %v922_v45 = vpop.trf.xlu0 }
 0x357   :  { %v1067_v55 = vmul.f32 %v1943_v28, %v922_v45 }
 0x35a   :  { %v923_v48 = vpop.trf.xlu0 }
 0x35b   :  { %v1069_v54 = vmul.f32 %v1945_v30, %v923_v48 }
 0x35d   :  { %v1099_v59 = vadd.f32 %v1069_v54, %v1067_v55 }
 0x35e   :  { %v924_v49 = vpop.trf.xlu0 }
 0x35f   :  { %v1071_v58 = vmul.f32 %v1947_v32, %v924_v49 }
 0x361   :  { %v1100_v0 = vadd.f32 %v1099_v59, %v1071_v58 }
 0x362   :  { %v925_v11 = vpop.trf.xlu0 }
 0x363   :  { %v1073_v60 = vmul.f32 %v1949_v34, %v925_v11 }
 0x365   :  { %v1101_v2 = vadd.f32 %v1100_v0, %v1073_v60 }
 0x366   :  { %v926_v50 = vpop.trf.xlu0 }
 0x367   :  { %v1075_v1 = vmul.f32 %v1951_v35, %v926_v50 }
 0x369   :  { %v1102_v25 = vadd.f32 %v1101_v2, %v1075_v1 }
 0x36a   :  { %v927_v52 = vpop.trf.xlu0 }
 0x36b   :  { %v1077_v3 = vmul.f32 %v1954_v38, %v927_v52 }
 0x36d   :  { %v1103_v7 = vadd.f32 %v1102_v25, %v1077_v3 }
 0x36e   :  { %v928_v46 = vpop.trf.xlu0 }
 0x36f   :  { %v1079_v6 = vmul.f32 %v1956_v41, %v928_v46 }
 0x371   :  { %v1104_v12 = vadd.f32 %v1103_v7, %v1079_v6 }
 0x372   :  { %v929_v57 = vpop.trf.xlu0 }
 0x373   :  { %v1081_v8 = vmul.f32 %v1958_v43, %v929_v57 }
 0x375   :  { %v1105_v37 = vadd.f32 %v1104_v12, %v1081_v8 }
 0x376   :  { %v954_v62 = vpop.trf.xlu1  ;;  %v930_v63 = vpop.trf.xlu0 }
 0x377   :  { %v1083_v13 = vmul.f32 %v1960_v44, %v930_v63  ;;  %v1068_v48 = vmul.f32 %v1943_v28, %v954_v62 }
 0x379   :  { %v1106_v17 = vadd.f32 %v1105_v37, %v1083_v13 }
 0x37a   :  { %v955_v4 = vpop.trf.xlu1  ;;  %v931_v5 = vpop.trf.xlu0 }
 0x37b   :  { %v1085_v14 = vmul.f32 %v1962_v42, %v931_v5  ;;  %v1070_v40 = vmul.f32 %v1945_v30, %v955_v4 }
 0x37d   :  { %v1107_v19 = vadd.f32 %v1106_v17, %v1085_v14  ;;  %v1120_v11 = vadd.f32 %v1070_v40, %v1068_v48 }
 0x37e   :  { %v956_v9 = vpop.trf.xlu1  ;;  %v932_v10 = vpop.trf.xlu0 }
 0x37f   :  { %v1087_v18 = vmul.f32 %v1964_v47, %v932_v10  ;;  %v1072_v49 = vmul.f32 %v1947_v32, %v956_v9 }
 0x381   :  { %v1108_v23 = vadd.f32 %v1107_v19, %v1087_v18  ;;  %v1121_v46 = vadd.f32 %v1120_v11, %v1072_v49 }
 0x382   :  { %v957_v15 = vpop.trf.xlu1  ;;  %v933_v16 = vpop.trf.xlu0 }
 0x383   :  { %v1089_v20 = vmul.f32 %v1966_v39, %v933_v16  ;;  %v1074_v50 = vmul.f32 %v1949_v34, %v957_v15 }
 0x385   :  { %v1109_v26 = vadd.f32 %v1108_v23, %v1089_v20  ;;  %v1122_v57 = vadd.f32 %v1121_v46, %v1074_v50 }
 0x386   :  { %v958_v21 = vpop.trf.xlu1  ;;  %v934_v22 = vpop.trf.xlu0 }
 0x387   :  { %v1091_v24 = vmul.f32 %v1968_v51, %v934_v22  ;;  %v1076_v54 = vmul.f32 %v1951_v35, %v958_v21  ;;  %v1772_v22 = vmov 1966171168  }
 0x388   :  { %v1152_v23 = vunpack.c.l.s4 %v1772_v22 }
 0x389   :  { %v1110_v31 = vadd.f32 %v1109_v26, %v1091_v24  ;;  %v1123_v59 = vadd.f32 %v1122_v57, %v1076_v54  ;;  %v1154_v24 = vlaneseq }
 0x38a   :  { %v959_v27 = vpop.trf.xlu1  ;;  %v935_v29 = vpop.trf.xlu0 }
 0x38b   :  { %v1093_v61 = vmul.f32 %v1970_v53, %v935_v29  ;;  %v1078_v55 = vmul.f32 %v1954_v38, %v959_v27  ;;  %vm1168_vm0 = vcmp.lt.s32.totalorder %v1154_v24, 256 }
 0x38d   :  { %v1111_v33 = vadd.f32 %v1110_v31, %v1093_v61  ;;  %v1124_v30 = vadd.f32 %v1123_v59, %v1078_v55  ;;  %v1153_v31 = vunpack.c.0.s8 %v1152_v23  ;;  %v1155_v61 = vshrl.u32 %v1154_v24, 7 }
 0x38e   :  { %v960_v36 = vpop.trf.xlu1  ;;  %v936_v8 = vpop.trf.xlu0 }
 0x38f   :  { %v1080_v60 = vmul.f32 %v1956_v41, %v960_v36  ;;  %v1095_v10 = vmul.f32 %v1973_v56, %v936_v8 }
 0x391   :  { %v1125_v62 = vadd.f32 %v1124_v30, %v1080_v60 }
 0x392   :  { %v961_v45 = vpop.trf.xlu1 }
 0x393   :  { %v1082_v63 = vmul.f32 %v1958_v43, %v961_v45  ;;  %v1156_v45 = vsub.s32 %v1153_v31, %v1155_v61 }
 0x395   :  { %v1126_v0 = vadd.f32 %v1125_v62, %v1082_v63 }
 0x396   :  { %v962_v52 = vpop.trf.xlu1 }
 0x397   :  { %v1084_v32 = vmul.f32 %v1960_v44, %v962_v52 }
 0x399   :  { %v1127_v2 = vadd.f32 %v1126_v0, %v1084_v32 }
 0x39a   :  { %v963_v58 = vpop.trf.xlu1 }
 0x39b   :  { %v1086_v34 = vmul.f32 %v1962_v42, %v963_v58  ;;  %v937_v42 = vpop.trf.xlu0 }
 0x39d   :  { %v1128_v3 = vadd.f32 %v1127_v2, %v1086_v34 }
 0x39e   :  { %v964_v28 = vpop.trf.xlu1 }
 0x39f   :  { %v1088_v35 = vmul.f32 %v1964_v47, %v964_v28 }
 0x3a1   :  { %v1129_v5 = vadd.f32 %v1128_v3, %v1088_v35 }
 0x3a2   :  { %v965_v1 = vpop.trf.xlu1 }
 0x3a3   :  { %v1090_v38 = vmul.f32 %v1966_v39, %v965_v1  ;;  %v1112_v39 = vadd.f32 %v1111_v33, %v1095_v10 }
 0x3a5   :  { %v1130_v25 = vadd.f32 %v1129_v5, %v1090_v38 }
 0x3a6   :  { %v966_v4 = vpop.trf.xlu1 }
 0x3a7   :  { %v1092_v41 = vmul.f32 %v1968_v51, %v966_v4 }
 0x3a9   :  { %v1131_v6 = vadd.f32 %v1130_v25, %v1092_v41 }
 0x3aa   :  { %v967_v43 = vpop.trf.xlu1 }
 0x3ab   :  { %v1094_v7 = vmul.f32 %v1970_v53, %v967_v43 }
 0x3ad   :  { %v1132_v44 = vadd.f32 %v1131_v6, %v1094_v7 }
 0x3ae   :  { %v968_v9 = vpop.trf.xlu1 }
 0x3af   :  { %v1096_v47 = vmul.f32 %v1973_v56, %v968_v9 }
 0x3b1   :  { %v1133_v37 = vadd.f32 %v1132_v44, %v1096_v47 }
 0x3b2   :  { %v969_v12 = vpop.trf.xlu1 }
 0x3bb   :  { %v1065_v13 = vpop.permute.xlu0 %1064 }
 0x3bc   :  { %v1097_v14 = vmul.f32 %v1065_v13, %v937_v42  ;;  %v1098_v15 = vmul.f32 %v1065_v13, %v969_v12 }
 0x3be   :  { %v1113_v51 = vadd.f32 %v1112_v39, %v1097_v14  ;;  %v1134_v16 = vadd.f32 %v1133_v37, %v1098_v15 }
 0x3bf   :  { %v1144_v40 = vpop.permute.xlu0 %1143 }
 0x3c0   :  { %v1114_v17 = vrot.slane %v1113_v51, 4  ;;  %v1135_v18 = vrot.slane %v1134_v16, 4 }
 0x3c2   :  { %v1115_v19 = vadd.f32 %v1114_v17, %v1113_v51  ;;  %v1136_v53 = vadd.f32 %v1135_v18, %v1134_v16 }
 0x3c4   :  { %v1116_v20 = vrot.slane %v1115_v19, 2  ;;  %v1137_v21 = vrot.slane %v1136_v53, 2 }
 0x3c6   :  { %v1117_v26 = vadd.f32 %v1116_v20, %v1115_v19  ;;  %v1138_v27 = vadd.f32 %v1137_v21, %v1136_v53 }
 0x3c8   :  { %v1118_v56 = vrot.slane %v1117_v26, 1  ;;  %v1139_v29 = vrot.slane %v1138_v27, 1 }
 0x3ca   :  { %v1119_v33 = vadd.f32 %v1118_v56, %v1117_v26  ;;  %v1140_v36 = vadd.f32 %v1139_v29, %v1138_v27 }
 0x3cc   :  { %v1146_v48 = vadd.f32 %v1144_v40, %v1119_v33  ;;  %v1147_v49 = vadd.f32 %v1144_v40, %v1140_v36 }
 0x3ce   :  { %v1150_v11 = vcombine.low %v1146_v48, %v1147_v49 }
 0x3d0   :  { %v1157_v50 = vrot.slane %v1150_v11, %v1156_v45 }
 0x3d2   :  { %v1164_v52 = vrot.slane %v1157_v50, %v1156_v45 }
 0x3d4   :  { %1170 = vst.msk [vmem:[#allocation7] sm:$0x3] %vm1168_vm0, %v1164_v52 }
 0x3d5   :  { %1750 = shalt.err (!%p1747_p6)
}
 0x3d6   :  { %s1751_s10 = scalar_lea.hbm %s2018_s2, 32 }
 0x3d7   :  { %p1752_p7 = scmp.ne.s32.totalorder %s2018_s2, %s1751_s10  ;;  %p1755_p8 = scmp.lt.u32.totalorder %s1751_s10, %s2018_s2 }
 0x3d9   :  { %p1757_p9 = pnand %p1755_p8, %p1752_p7 }
 0x3db   :  { %1760 = shalt.err (!%p1757_p9)
}
 0x3dc   :  { %1180 = dma.vmem_to_hbm [thread:$0]  %s1178_s6, 32, %s2018_s2, [#allocation4]  }
 0x3dd   :  { %1765 = dma.done.wait [#allocation4], 32  }
 0x3de   :  { %1766 = vsyncadd [#allocation4], 4294967264 }
 0x3df   :  { %1184 = vsyncpa [#allocation3], 1 }
 0x3e0   :  { %1185 = vsyncpa [#allocation6], 1 }
 0x3e1   :  { %1186 = vsyncpa [#allocation4], 1 }

</bundles_post_ra>
